<compile_context>
chip_gen: v5e
topology: v5e:2x2
jax: 0.10.0
libtpu: 0.0.40
codegen_flags: <defaults>
</compile_context>

<pallas_src>
import functools

import jax
import jax.numpy as jnp
from jax.experimental import pallas as pl
from jax.experimental.pallas import tpu as pltpu


# --------------------------- shared head compute --------------------------- #
def _head(pooled, w1_ref, b1_ref, w2t_ref, b2_ref, labels_ref,
          logits_ref, sqerr_ref, num_labels):
    # dense -> tanh: bf16 MXU inputs, f32 accumulate
    x = jnp.tanh(
        jnp.dot(pooled.astype(w1_ref.dtype), w1_ref[...],
                preferred_element_type=jnp.float32)
        + b1_ref[...])                                                  # (Bt, H) f32

    if num_labels == 1:
        # An N=1 MXU pass wastes the systolic array width; lane-wise multiply
        # + row reduce on the VPU/XLU is cheaper and frees the MXU/output path.
        logits = jnp.sum(x * w2t_ref[...], axis=-1, keepdims=True) + b2_ref[...]
    else:
        logits = jax.lax.dot_general(
            x, w2t_ref[...], (((1,), (1,)), ((), ())),
            preferred_element_type=jnp.float32) + b2_ref[...]           # (Bt, L)
    logits_ref[...] = logits.astype(logits_ref.dtype)

    # Per-example squared error; batch-mean finalize happens in the wrapper
    # (required once B is gridded / sharded across cores).
    # TODO(synk): only meaningful for num_labels == 1 (guarded in the wrapper).
    diff = logits[:, 0:1] - labels_ref[...]
    sqerr_ref[...] = diff * diff


# --------------------- kernel A: whole sequence per step ------------------- #
def _adapter_kernel_fused(h_ref, w1_ref, b1_ref, w2t_ref, b2_ref, labels_ref,
                          logits_ref, sqerr_ref, *, seq_len, num_labels):
    # h_ref: (Bt, S, H) full-sequence hidden-state slab (contiguous DMA, no scratch)
    pooled = jnp.sum(h_ref[...], axis=1, dtype=jnp.float32) * jnp.float32(1.0 / seq_len)
    _head(pooled, w1_ref, b1_ref, w2t_ref, b2_ref, labels_ref,
          logits_ref, sqerr_ref, num_labels)


# ------------------ kernel B: streamed S-axis reduction -------------------- #
def _adapter_kernel_streamed(h_ref, w1_ref, b1_ref, w2t_ref, b2_ref, labels_ref,
                             logits_ref, sqerr_ref, acc_ref, *, seq_len, num_labels):
    # h_ref: (Bt, St, H) streamed tile; acc_ref: (Bt, H) f32 pooled-sum accumulator
    s = pl.program_id(1)

    @pl.when(s == 0)
    def _init():
        acc_ref[...] = jnp.zeros_like(acc_ref)

    # Partial sequence sum in f32 without materializing an f32 copy of the tile.
    acc_ref[...] += jnp.sum(h_ref[...], axis=1, dtype=jnp.float32)

    @pl.when(s == pl.num_programs(1) - 1)
    def _finalize():
        pooled = acc_ref[...] * jnp.float32(1.0 / seq_len)
        _head(pooled, w1_ref, b1_ref, w2t_ref, b2_ref, labels_ref,
              logits_ref, sqerr_ref, num_labels)


# ------------------------ per-generation VMEM budget ----------------------- #
def _vmem_limit_bytes():
    cap = 64 * 1024 * 1024                      # conservative fallback (v7x per-TC VMEM)
    try:
        info = pltpu.get_tpu_info()
        cap = int(getattr(info, "vmem_capacity_bytes", cap))
    except Exception:
        pass
    # ~108 MiB on 128 MiB parts (v5e/v6e), ~54 MiB on the 64 MiB v7x part.
    return max(32 * 1024 * 1024, min(int(cap * 0.85), cap - 8 * 1024 * 1024))


# ------------------------------- tile picker ------------------------------- #
def _pick_tiles(B, S, H, h_itemsize, h_budget_bytes):
    """Return (b_tile, s_tile, collapse_s)."""
    # b tile: as large as possible (cap 256), but keep >= 2 B-tiles when B cleanly
    # allows it so the "parallel" batch axis can shard across v7x's two TensorCores.
    b_cap = min(256, B // 2) if B % 16 == 0 else min(256, B)
    b_cands = [d for d in range(B, 0, -1)
               if B % d == 0 and d <= b_cap and (d % 8 == 0 or d == B)]
    if not b_cands:
        b_cands = [B]

    # Prefer collapsing the S axis entirely: contiguous (b_tile, S, H) slab per step,
    # no accumulator scratch, no init/finalize branches, fewest grid steps.
    for bt in b_cands:                           # largest b_tile first
        if 2 * bt * S * H * h_itemsize <= h_budget_bytes:
            return bt, S, True

    # Fall back to streaming S with the biggest tile that fits the (double-buffered)
    # budget; sequence tile stays a sublane multiple (16 for bf16).
    bt = b_cands[-1]
    s_cands = [d for d in range(S, 0, -1)
               if S % d == 0 and (d % 16 == 0 or d == S)]
    for st in s_cands:
        if 2 * bt * st * H * h_itemsize <= h_budget_bytes:
            return bt, st, False
    return bt, s_cands[-1], False


# --------------------------------- wrapper --------------------------------- #
def adapter_forward(hidden_states, w1, b1, w2, b2, labels=None):
    B, S, H = hidden_states.shape
    L = w2.shape[1]

    vmem_limit = _vmem_limit_bytes()
    # Resident weights (default double-buffered): bf16 W1 + f32 biases / W2^T.
    resident = 2 * (H * H * 2 + H * 4 + L * H * 4 + L * 4)
    h_budget = int(0.9 * max(vmem_limit - resident - 2 * 1024 * 1024, 1))
    b_tile, s_tile, collapse_s = _pick_tiles(
        B, S, H, hidden_states.dtype.itemsize, h_budget)
    nb = B // b_tile

    labels_arr = labels if labels is not None else jnp.zeros((B,), jnp.float32)
    labels2 = labels_arr.reshape(B, 1).astype(jnp.float32)
    w1_b = w1.astype(jnp.bfloat16)               # native MXU input; halves W1 DMA/VMEM
    w2t = jnp.transpose(w2).astype(jnp.float32)  # (L, H): lane-dense for the VPU reduce
    b1r = b1.reshape(1, H).astype(jnp.float32)
    b2r = b2.reshape(1, L).astype(jnp.float32)

    h_bytes = hidden_states.size * hidden_states.dtype.itemsize
    cost = pl.CostEstimate(
        flops=2 * B * H * H + 2 * B * H * L + B * S * H,
        transcendentals=B * H,
        bytes_accessed=h_bytes + 2 * w1_b.size
        + 4 * (b1r.size + w2t.size + b2r.size + labels2.size + B * L + B))

    out_shape = (jax.ShapeDtypeStruct((B, L), jnp.float32),
                 jax.ShapeDtypeStruct((B, 1), jnp.float32))

    # TODO(synk): on v7x, pipeline_mode=pl.Buffered(1) on the constant-index_map weight
    # specs would drop their second buffer; skipped here to keep lowering conservative.
    if collapse_s:
        kernel = functools.partial(_adapter_kernel_fused, seq_len=S, num_labels=L)
        grid_spec = pltpu.PrefetchScalarGridSpec(
            num_scalar_prefetch=0,
            grid=(nb,),                                   # B only; S folded into the block
            in_specs=[
                pl.BlockSpec((b_tile, S, H), lambda b: (b, 0, 0)),   # contiguous slab
                pl.BlockSpec((H, H), lambda b: (0, 0)),              # resident
                pl.BlockSpec((1, H), lambda b: (0, 0)),              # resident
                pl.BlockSpec((L, H), lambda b: (0, 0)),              # resident
                pl.BlockSpec((1, L), lambda b: (0, 0)),              # resident
                pl.BlockSpec((b_tile, 1), lambda b: (b, 0)),
            ],
            out_specs=(pl.BlockSpec((b_tile, L), lambda b: (b, 0)),
                       pl.BlockSpec((b_tile, 1), lambda b: (b, 0))),
            scratch_shapes=[],
        )
        dims = ("parallel",)
    else:
        ns = S // s_tile
        kernel = functools.partial(_adapter_kernel_streamed, seq_len=S, num_labels=L)
        grid_spec = pltpu.PrefetchScalarGridSpec(
            num_scalar_prefetch=0,
            grid=(nb, ns),                                # B (parallel) outer, S reduction last
            in_specs=[
                pl.BlockSpec((b_tile, s_tile, H), lambda b, s: (b, s, 0)),  # streamed
                pl.BlockSpec((H, H), lambda b, s: (0, 0)),                  # resident
                pl.BlockSpec((1, H), lambda b, s: (0, 0)),                  # resident
                pl.BlockSpec((L, H), lambda b, s: (0, 0)),                  # resident
                pl.BlockSpec((1, L), lambda b, s: (0, 0)),                  # resident
                pl.BlockSpec((b_tile, 1), lambda b, s: (b, 0)),
            ],
            out_specs=(pl.BlockSpec((b_tile, L), lambda b, s: (b, 0)),
                       pl.BlockSpec((b_tile, 1), lambda b, s: (b, 0))),
            scratch_shapes=[pltpu.VMEM((b_tile, H), jnp.float32)],
        )
        dims = ("parallel", "arbitrary")

    logits, sqerr = pl.pallas_call(
        kernel,
        out_shape=out_shape,
        grid_spec=grid_spec,
        compiler_params=pltpu.CompilerParams(
            dimension_semantics=dims,
            vmem_limit_bytes=int(vmem_limit)),
        cost_estimate=cost,
    )(hidden_states, w1_b, b1r, w2t, b2r, labels2)

    loss = None
    if labels is not None:
        if L != 1:
            # torch MSELoss(logits.squeeze(-1), labels) is only well defined for L == 1.
            raise NotImplementedError("loss path requires num_labels == 1")
        # MSE mean reduction over the full batch.
        loss = jnp.sum(sqerr) / jnp.float32(B)
    return loss, logits


# ----------------------- deterministic parameter init --------------------- #
def init_params(key, hidden_size, num_labels, vocab_size):
    k_emb, k_w1, k_b1, k_w2, k_b2 = jax.random.split(key, 5)
    # frozen "pretrained" embedding table standing in for the encoder
    embed = jax.random.normal(k_emb, (vocab_size, hidden_size), jnp.float32) * 0.02
    # nn.Linear-style uniform init, deterministic
    lim1 = 1.0 / jnp.sqrt(hidden_size)
    w1 = jax.random.uniform(k_w1, (hidden_size, hidden_size), jnp.float32, -lim1, lim1)
    b1 = jax.random.uniform(k_b1, (1, hidden_size), jnp.float32, -lim1, lim1)
    w2 = jax.random.uniform(k_w2, (hidden_size, num_labels), jnp.float32, -lim1, lim1)
    b2 = jax.random.uniform(k_b2, (1, num_labels), jnp.float32, -lim1, lim1)
    return embed, w1, b1, w2, b2


# -------------------------------- main ------------------------------------ #
if __name__ == "__main__":
    # Small but hardware-aligned shapes: H multiple of 128, S tileable by 16, B by 8.
    B, S, H = 16, 32, 128
    NUM_LABELS = 1              # regression head
    VOCAB = 32

    key = jax.random.PRNGKey(0)
    k_params, k_ids, k_labels = jax.random.split(key, 3)

    embed, w1, b1, w2, b2 = init_params(k_params, H, NUM_LABELS, VOCAB)

    input_ids = jax.random.randint(k_ids, (B, S), 0, VOCAB)
    labels = jax.random.normal(k_labels, (B,), jnp.float32)

    # Frozen encoder stand-in (glue, plain JAX): embedding lookup -> hidden_states.
    # Streamed into the kernel as bf16 (typical encoder output dtype, halves HBM traffic).
    hidden_states = embed[input_ids].astype(jnp.bfloat16)      # (B, S, H)

    loss, logits = adapter_forward(hidden_states, w1, b1, w2, b2, labels)
    jax.block_until_ready((loss, logits))

    # quick sanity check against a pure-JAX reference (same bf16 hidden states)
    h32 = hidden_states.astype(jnp.float32)
    pooled_ref = jnp.mean(h32, axis=1)
    x_ref = jnp.tanh(pooled_ref @ w1 + b1)
    logits_ref = x_ref @ w2 + b2
    loss_ref = jnp.mean((logits_ref[:, 0] - labels) ** 2)
    assert jnp.allclose(logits, logits_ref, atol=2e-3, rtol=1e-2), "logits mismatch"
    assert jnp.allclose(loss, loss_ref, atol=1e-2, rtol=1e-2), "loss mismatch"

    print("KERNEL_OK")
</pallas_src>

<mosaic_0001>
module attributes {stable_mosaic.version = 11 : i64} {
  func.func @_adapter_kernel_fused(%arg0: i32, %arg1: memref<8x32x128xbf16, #tpu.memory_space<vmem>>, %arg2: memref<128x128xbf16, #tpu.memory_space<vmem>>, %arg3: memref<1x128xf32, #tpu.memory_space<vmem>>, %arg4: memref<1x128xf32, #tpu.memory_space<vmem>>, %arg5: memref<1x1xf32, #tpu.memory_space<vmem>>, %arg6: memref<8x1xf32, #tpu.memory_space<vmem>>, %arg7: memref<8x1xf32, #tpu.memory_space<vmem>>, %arg8: memref<8x1xf32, #tpu.memory_space<vmem>>) attributes {dimension_semantics = [#tpu.dimension_semantics<parallel>], iteration_bounds = array<i64: 2>, scalar_prefetch = 0 : i64, scratch_operands = 0 : i64, tpu.core_type = #tpu.core_type<tc>, window_params = [{transform_indices = @transform_0, window_bounds = array<i64: 8, 32, 128>}, {pipeline_mode = #tpu.pipeline_mode<synchronous>, transform_indices = @transform_1, window_bounds = array<i64: 128, 128>}, {pipeline_mode = #tpu.pipeline_mode<synchronous>, transform_indices = @transform_2, window_bounds = array<i64: 1, 128>}, {pipeline_mode = #tpu.pipeline_mode<synchronous>, transform_indices = @transform_3, window_bounds = array<i64: 1, 128>}, {pipeline_mode = #tpu.pipeline_mode<synchronous>, transform_indices = @transform_4, window_bounds = array<i64: 1, 1>}, {transform_indices = @transform_5, window_bounds = array<i64: 8, 1>}, {transform_indices = @transform_6, window_bounds = array<i64: 8, 1>}, {transform_indices = @transform_7, window_bounds = array<i64: 8, 1>}]} {
    %c0 = arith.constant 0 : index
    %c0_0 = arith.constant 0 : index
    %c0_1 = arith.constant 0 : index
    %0 = vector.load %arg1[%c0, %c0_0, %c0_1] : memref<8x32x128xbf16, #tpu.memory_space<vmem>>, vector<8x32x128xbf16>
    %1 = arith.extf %0 : vector<8x32x128xbf16> to vector<8x32x128xf32>
    %cst = arith.constant dense<0.000000e+00> : vector<8x128xf32>
    %2 = vector.multi_reduction <add>, %1, %cst [1] : vector<8x32x128xf32> to vector<8x128xf32>
    %cst_2 = arith.constant 3.125000e-02 : f32
    %3 = vector.broadcast %cst_2 : f32 to vector<8x128xf32>
    %4 = arith.mulf %2, %3 : vector<8x128xf32>
    %5 = arith.truncf %4 : vector<8x128xf32> to vector<8x128xbf16>
    %c0_3 = arith.constant 0 : index
    %c0_4 = arith.constant 0 : index
    %6 = vector.load %arg2[%c0_3, %c0_4] : memref<128x128xbf16, #tpu.memory_space<vmem>>, vector<128x128xbf16>
    %cst_5 = arith.constant dense<0.000000e+00> : vector<8x128xf32>
    %7 = tpu.matmul %5, %6, %cst_5 {dimension_numbers = #tpu.dot_dimension_numbers<[1], [0], [0], [1], [0, 0, 1, 1], [], []>} : vector<8x128xbf16>, vector<128x128xbf16>, vector<8x128xf32> -> vector<8x128xf32>
    %c0_6 = arith.constant 0 : index
    %c0_7 = arith.constant 0 : index
    %8 = vector.load %arg3[%c0_6, %c0_7] : memref<1x128xf32, #tpu.memory_space<vmem>>, vector<1x128xf32>
    %9 = vector.broadcast %8 : vector<1x128xf32> to vector<8x128xf32>
    %10 = arith.addf %7, %9 : vector<8x128xf32>
    %11 = math.tanh %10 : vector<8x128xf32>
    %c0_8 = arith.constant 0 : index
    %c0_9 = arith.constant 0 : index
    %12 = vector.load %arg4[%c0_8, %c0_9] : memref<1x128xf32, #tpu.memory_space<vmem>>, vector<1x128xf32>
    %13 = vector.broadcast %12 : vector<1x128xf32> to vector<8x128xf32>
    %14 = arith.mulf %11, %13 : vector<8x128xf32>
    %cst_10 = arith.constant dense<0.000000e+00> : vector<8xf32>
    %15 = vector.multi_reduction <add>, %14, %cst_10 [1] : vector<8x128xf32> to vector<8xf32>
    %16 = vector.shape_cast %15 : vector<8xf32> to vector<8x1xf32>
    %c0_11 = arith.constant 0 : index
    %c0_12 = arith.constant 0 : index
    %17 = vector.load %arg5[%c0_11, %c0_12] : memref<1x1xf32, #tpu.memory_space<vmem>>, vector<1x1xf32>
    %18 = vector.broadcast %17 : vector<1x1xf32> to vector<8x1xf32>
    %19 = arith.addf %16, %18 : vector<8x1xf32>
    %c0_13 = arith.constant 0 : index
    %c0_14 = arith.constant 0 : index
    %20 = vector.load %arg7[%c0_13, %c0_14] : memref<8x1xf32, #tpu.memory_space<vmem>>, vector<8x1xf32>
    tpu.vector_store %arg7[%c0_13, %c0_14], %19 {strides = array<i32>} : memref<8x1xf32, #tpu.memory_space<vmem>>, vector<8x1xf32>,
    %c0_15 = arith.constant 0 : index
    %c0_16 = arith.constant 0 : index
    %21 = vector.load %arg6[%c0_15, %c0_16] : memref<8x1xf32, #tpu.memory_space<vmem>>, vector<8x1xf32>
    %22 = arith.subf %19, %21 : vector<8x1xf32>
    %23 = arith.mulf %22, %22 : vector<8x1xf32>
    %c0_17 = arith.constant 0 : index
    %c0_18 = arith.constant 0 : index
    %24 = vector.load %arg8[%c0_17, %c0_18] : memref<8x1xf32, #tpu.memory_space<vmem>>, vector<8x1xf32>
    tpu.vector_store %arg8[%c0_17, %c0_18], %23 {strides = array<i32>} : memref<8x1xf32, #tpu.memory_space<vmem>>, vector<8x1xf32>,
    return
  }
  func.func @transform_0(%arg0: i32) -> (i32, i32, i32) {
    %c0_i32 = arith.constant 0 : i32
    %c0_i32_0 = arith.constant 0 : i32
    %c0_i32_1 = arith.constant 0 : i32
    return %arg0, %c0_i32, %c0_i32_0 : i32, i32, i32
  }
  func.func @transform_1(%arg0: i32) -> (i32, i32) {
    %c0_i32 = arith.constant 0 : i32
    %c0_i32_0 = arith.constant 0 : i32
    %c0_i32_1 = arith.constant 0 : i32
    return %c0_i32, %c0_i32_0 : i32, i32
  }
  func.func @transform_2(%arg0: i32) -> (i32, i32) {
    %c0_i32 = arith.constant 0 : i32
    %c0_i32_0 = arith.constant 0 : i32
    %c0_i32_1 = arith.constant 0 : i32
    return %c0_i32, %c0_i32_0 : i32, i32
  }
  func.func @transform_3(%arg0: i32) -> (i32, i32) {
    %c0_i32 = arith.constant 0 : i32
    %c0_i32_0 = arith.constant 0 : i32
    %c0_i32_1 = arith.constant 0 : i32
    return %c0_i32, %c0_i32_0 : i32, i32
  }
  func.func @transform_4(%arg0: i32) -> (i32, i32) {
    %c0_i32 = arith.constant 0 : i32
    %c0_i32_0 = arith.constant 0 : i32
    %c0_i32_1 = arith.constant 0 : i32
    return %c0_i32, %c0_i32_0 : i32, i32
  }
  func.func @transform_5(%arg0: i32) -> (i32, i32) {
    %c0_i32 = arith.constant 0 : i32
    %c0_i32_0 = arith.constant 0 : i32
    return %arg0, %c0_i32 : i32, i32
  }
  func.func @transform_6(%arg0: i32) -> (i32, i32) {
    %c0_i32 = arith.constant 0 : i32
    %c0_i32_0 = arith.constant 0 : i32
    return %arg0, %c0_i32 : i32, i32
  }
  func.func @transform_7(%arg0: i32) -> (i32, i32) {
    %c0_i32 = arith.constant 0 : i32
    %c0_i32_0 = arith.constant 0 : i32
    return %arg0, %c0_i32 : i32, i32
  }
}

</mosaic_0001>

<bundles_post_ra>
// kernel: tpu_custom_call.1
= control target key start
LH: loop header
LB: loop body
LE: loop exit
PB: predicated region body
PF: predicated region fallthrough
CT: control target
= control target key end

     0   :  { %s1239_s0 = inlined_call_operand.hbm [shape: bf16[16,32,128], index: 0, kind: input, shape index: {}]   ;;  %s1240_s1 = inlined_call_operand.hbm [shape: bf16[128,128], index: 1, kind: input, shape index: {}]   ;;  %s1241_s2 = inlined_call_operand.vmem [shape: f32[1,128], index: 2, kind: input, shape index: {}]   ;;  %s1242_s3 = inlined_call_operand.vmem [shape: f32[1,128], index: 3, kind: input, shape index: {}]   ;;  %s1243_s4 = inlined_call_operand.<no memory space> [shape: f32[1,1], index: 4, kind: input, shape index: {}]   ;;  %s1244_s5 = inlined_call_operand.vmem [shape: f32[16,1], index: 5, kind: input, shape index: {}]   ;;  %s1245_s6 = inlined_call_operand.vmem [shape: f32[16,1], index: 6, kind: output, shape index: {0}]   ;;  %s1246_s7 = inlined_call_operand.vmem [shape: f32[16,1], index: 7, kind: output, shape index: {1}]  }
   0x1   :  { %v13_v0 = vstv %s1243_s4 }
   0x2   :  { %14 = vst [vmem:[#allocation2] sm:$0x1] %v13_v0 }
   0x3   :  { %15 = vsyncpa [#allocation4], 0 }
   0x4   :  { %17 = vsyncpa [#allocation4 + $0x1], 0 }
   0x5   :  { %18 = vsyncpa [#allocation6], 0  ;;  %s1090_s26 = smov 0   ;;  %s1092_s27 = smov 0  }
   0x6   :  { %s1094_s28 = smov 0   ;;  %s1096_s29 = smov 0  }
   0x7 LB: > { %s1109_s4 = sadd.s32 4294967295, %s1042_s29   ;;  %p44_p0 = scmp.ne.s32.totalorder %s1034_s27, %s1030_s26  ;;  %s1042_s29 = sphi %s1096_s29, %s1253_s29   ;;  %s1038_s28 = sphi %s1094_s28, %s1252_s28   ;;  %s1034_s27 = sphi %s1092_s27, %s1251_s27   ;;  %s1030_s26 = sphi %s1090_s26, %s1250_s26  }
   0x8   : > { %p45_p1 = scmp.eq.s32.totalorder %s1109_s4, 0  ;;  %p751_p2 = scmp.ge.s32.totalorder %s1042_s29, 1 }
   0x9   : > { %p217_p3 = scmp.lt.s32.totalorder %s1042_s29, 3  ;;  %s228_s10 = sshll.u32 %s1240_s1, 4  ;;  %s229_s10 = int_to_ptr.hbm [resolvable:$true] %s228_s10 }
   0xa   : > { %p1117_p4 = por %p45_p1, %p44_p0  ;;  %s1044_s12 = smov [#allocation5]  }
   0xb   : > { %p1124_p5 = pnand %p751_p2, %p217_p3  ;;  %s230_s13 = sshll.u32 %s1044_s12, 4  ;;  %s231_s13 = int_to_ptr.vmem [resolvable:$true] %s230_s13 }
   0xc   : > { %s1133_s14 = sadd.s32 1, %s1042_s29   ;;  %s1045_s15 = smov 64  }
   0xd   : > { %p893_p6 = pneg %p1124_p5  ;;  %s1046_s16 = smov 4  }
   0xe   : > { %s28_s17 = ssub.s32 %s1042_s29, %s1133_s14  ;;  %s31_s18 = sadd.s32 1, %s1038_s28 }
   0xf   : > { %p894_p7 = pnand %p893_p6, %p45_p1  ;;  %p29_p8 = scmp.eq.s32.totalorder %s28_s17, 0 }
  0x10   : > { %p38_p9 = scmp.ne.s32.totalorder %s1038_s28, %s1034_s27  ;;  %p39_p10 = scmp.eq.s32.totalorder %s1042_s29, 0 }
  0x11   : > { %896 = dma.hbm_to_vmem [thread:$0]  (!%p894_p7), %s229_s10, 1024, %s231_s13, [#allocation6], %s1045_s15, %s1045_s15, %s1046_s16  }
  0x12   : > { %p902_p11 = scmp.lt.s32.totalorder %s1042_s29, 2  ;;  %p40_p12 = por %p39_p10, %p38_p9 }
  0x13   : > { %s1146_s19 = scalar_select %p29_p8, %s1038_s28, %s31_s18  }
  0x14   : > { %s253_s20 = sand.u32 1, %s1038_s28   ;;  %s799_s22 = sshll.u32 %s1042_s29, 7 }
  0x15   : > { %s754_s21 = sshll.u32 %s253_s20, 7  ;;  %s263_s25 = scalar_lea.hbm %s1239_s0, %s799_s22 }
  0x16   : > { %s257_s26 = scalar_lea.vmem [#allocation3], %s754_s21  ;;  %s264_s9 = sshll.u32 %s263_s25, 4  ;;  %s265_s9 = int_to_ptr.hbm [resolvable:$true] %s264_s9 }
  0x17   : > { %s266_s8 = sshll.u32 %s257_s26, 4  ;;  %p1153_p13 = pnand %p902_p11, %p40_p12  ;;  %s267_s8 = int_to_ptr.vmem [resolvable:$true] %s266_s8 }
  0x18   : > { %s254_s12 = scalar_lea.sflag [#allocation4], %s253_s20  ;;  %s974_s13 = sshra.s32 %s265_s9, 4  ;;  %s975_s13 = int_to_ptr.hbm [resolvable:$true] %s974_s13 }
  0x19   : > { %s976_s17 = scalar_lea.hbm %s975_s13, 128  ;;  %p978_p2 = pneg %p1153_p13 }
  0x1a   : > { %p977_p0 = scmp.ne.s32.totalorder %s975_s13, %s976_s17  ;;  %s981_s21 = scalar_lea.hbm %s1239_s0, 256 }
  0x1b   : > { %p982_p7 = scmp.lt.s32.totalorder %s975_s13, %s1239_s0  ;;  %p983_p8 = scmp.lt.s32.totalorder %s981_s21, %s976_s17 }
  0x1c   : > { %p979_p3 = pnand %p978_p2, %p977_p0 }
  0x1d   : > { %p984_p9 = por %p983_p8, %p982_p7 }
  0x1e   : > { %p980_p6 = pneg %p979_p3 }
  0x20   : > { %p985_p10 = pnand %p984_p9, %p980_p6 }
  0x22   : > { %988 = shalt.err (!%p985_p10)
}
  0x23   : > { %900 = dma.hbm_to_vmem [thread:$0]  (!%p1153_p13), %s265_s9, 2048, %s267_s8, %s254_s12, %s1045_s15, %s1045_s15, %s1046_s16  }
  0x24   : > { %285 = sbr.rel (%p1124_p5) target bundleno = 347 (0x15b), region = 44  ;;  %s287_s20 = sand.u32 (!%p1124_p5), 1, %s1034_s27  }
  0x25   : > { %s759_s24 = sshll.u32 (!%p1124_p5), %s287_s20, 7  ;;  %s288_s25 = scalar_lea.sflag (!%p1124_p5), [#allocation4], %s287_s20 }
  0x26   : > { %s1173_s26 = scalar_lea.vmem (!%p1124_p5), [#allocation3], %s759_s24 }
  0x29   : > { %1021 = dma.done.wait (%p1117_p4), %s288_s25, 2048  }
  0x2a   : > { %1023 = vsyncadd (%p1117_p4), %s288_s25, 4294965248 }
  0x2b   : > { %1025 = dma.done.wait (%p45_p1), [#allocation6], 1024  }
  0x2c   : > { %1027 = vsyncadd (%p45_p1), [#allocation6], 4294966272  ;;  %v807_v1 = vld [vmem:[#allocation5 + $0x38] sm:$0xff]  ;;  %v806_v2 = vld [vmem:[#allocation5 + $0x30] sm:$0xff]  ;;  %vm536_vm0 = vcmask 1041409   ;;  %vm538_vm1 = vcmask 1042434  }
  0x2d   : > { %600 = vmatpush.bf16.msra.mxu0 %v807_v1  ;;  %v809_v3 = vld [vmem:[%s1173_s26] sm:$0xff]   ;;  %v1185_v6 = vld [vmem:[%s1173_s26 + $0x8] sm:$0xff]   ;;  %v873_v7 = vld [vmem:[%s1173_s26 + $0x10] sm:$0xff]   ;;  %vm540_vm2 = vcmask 1043459   ;;  %vm542_vm3 = vcmask 1044484   ;;  %vm544_vm4 = vcmask 1045509  }
  0x2e   : > { %v810_v4 = vunpack.c.l.bf16 %v809_v3  ;;  %v811_v5 = vunpack.c.h.bf16 %v809_v3  ;;  %v1189_v8 = vld [vmem:[%s1173_s26 + $0x18] sm:$0xff]   ;;  %v805_v9 = vld [vmem:[#allocation5 + $0x28] sm:$0xff]  ;;  %v814_v10 = vunpack.c.l.bf16 %v1185_v6  ;;  %v815_v11 = vunpack.c.h.bf16 %v1185_v6  ;;  %v875_v14 = vld [vmem:[%s1173_s26 + $0x20] sm:$0xff]   ;;  %p336_p1 = scmp.lt.s32.totalorder %s1109_s4, 1 }
  0x2f   : > { %v818_v12 = vunpack.c.l.bf16 %v873_v7  ;;  %v819_v13 = vunpack.c.h.bf16 %v873_v7  ;;  %v876_v15 = vld [vmem:[%s1173_s26 + $0x28] sm:$0xff]   ;;  %v877_v16 = vld [vmem:[%s1173_s26 + $0x30] sm:$0xff]   ;;  %v822_v17 = vunpack.c.l.bf16 %v1189_v8  ;;  %v823_v18 = vunpack.c.h.bf16 %v1189_v8  ;;  %v878_v21 = vld [vmem:[%s1173_s26 + $0x38] sm:$0xff]  }
  0x30   : > { %v826_v19 = vunpack.c.l.bf16 %v875_v14  ;;  %v827_v20 = vunpack.c.h.bf16 %v875_v14  ;;  %v879_v22 = vld [vmem:[%s1173_s26 + $0x40] sm:$0xff]   ;;  %v880_v23 = vld [vmem:[%s1173_s26 + $0x48] sm:$0xff]   ;;  %v830_v24 = vunpack.c.l.bf16 %v876_v15  ;;  %v831_v25 = vunpack.c.h.bf16 %v876_v15  ;;  %v881_v28 = vld [vmem:[%s1173_s26 + $0x50] sm:$0xff]   ;;  %s1255_s4 = smov (!%p336_p1, %s1109_s4), 1 }
  0x31   : > { %601 = vmatpush.bf16.msra.mxu0 %v806_v2  ;;  %v834_v26 = vunpack.c.l.bf16 %v877_v16  ;;  %v835_v27 = vunpack.c.h.bf16 %v877_v16  ;;  %v882_v29 = vld [vmem:[%s1173_s26 + $0x58] sm:$0xff]   ;;  %v883_v30 = vld [vmem:[%s1173_s26 + $0x60] sm:$0xff]   ;;  %v838_v31 = vunpack.c.l.bf16 %v878_v21  ;;  %v839_v32 = vunpack.c.h.bf16 %v878_v21  ;;  %v884_v35 = vld [vmem:[%s1173_s26 + $0x68] sm:$0xff]   ;;  %s761_s8 = sshll.u32 %s1255_s4, 3 }
  0x32   : > { %v842_v33 = vunpack.c.l.bf16 %v879_v22  ;;  %v843_v34 = vunpack.c.h.bf16 %v879_v22  ;;  %v885_v36 = vld [vmem:[%s1173_s26 + $0x70] sm:$0xff]   ;;  %v886_v37 = vld [vmem:[%s1173_s26 + $0x78] sm:$0xff]   ;;  %v846_v38 = vunpack.c.l.bf16 %v880_v23  ;;  %v847_v39 = vunpack.c.h.bf16 %v880_v23  ;;  %v804_v46 = vld [vmem:[#allocation5 + $0x20] sm:$0xff]  ;;  %s339_s12 = scalar_lea.vmem %s1244_s5, %s761_s8  ;;  %s343_s29 = scalar_lea.vmem %s1245_s6, %s761_s8 }
  0x33   : > { %v850_v40 = vunpack.c.l.bf16 %v881_v28  ;;  %v851_v41 = vunpack.c.h.bf16 %v881_v28  ;;  %v854_v42 = vunpack.c.l.bf16 %v882_v29  ;;  %v855_v43 = vunpack.c.h.bf16 %v882_v29  ;;  %v803_v63 = vld [vmem:[#allocation5 + $0x18] sm:$0xff]  ;;  %s347_s22 = scalar_lea.vmem %s1246_s7, %s761_s8 }
  0x34   : > { %v858_v44 = vunpack.c.l.bf16 %v883_v30  ;;  %v859_v45 = vunpack.c.h.bf16 %v883_v30  ;;  %v862_v47 = vunpack.c.l.bf16 %v884_v35  ;;  %v863_v48 = vunpack.c.h.bf16 %v884_v35 }
  0x35   : > { %602 = vmatpush.bf16.msra.mxu0 %v805_v9  ;;  %v866_v49 = vunpack.c.l.bf16 %v885_v36  ;;  %v867_v50 = vunpack.c.h.bf16 %v885_v36  ;;  %v870_v51 = vunpack.c.l.bf16 %v886_v37  ;;  %v871_v52 = vunpack.c.h.bf16 %v886_v37 }
  0x36   : > { %v412_v53 = vadd.f32 %v811_v5, %v810_v4  ;;  %v421_v54 = vadd.f32 %v819_v13, %v818_v12  ;;  %v430_v55 = vadd.f32 %v827_v20, %v826_v19  ;;  %v439_v56 = vadd.f32 %v835_v27, %v834_v26 }
  0x37   : > { %v448_v57 = vadd.f32 %v843_v34, %v842_v33  ;;  %v457_v58 = vadd.f32 %v851_v41, %v850_v40  ;;  %v466_v61 = vadd.f32 %v859_v45, %v858_v44  ;;  %v475_v62 = vadd.f32 %v867_v50, %v866_v49  ;;  %v801_v33 = vld [vmem:[#allocation5 + $0x8] sm:$0xff]  ;;  %v800_v50 = vld [vmem:[#allocation5] sm:$0xff] }
  0x38   : > { %v413_v59 = vadd.f32 %v814_v10, %v412_v53  ;;  %v422_v60 = vadd.f32 %v822_v17, %v421_v54  ;;  %v431_v0 = vadd.f32 %v830_v24, %v430_v55  ;;  %v440_v1 = vadd.f32 %v838_v31, %v439_v56  ;;  %v802_v17 = vld [vmem:[#allocation5 + $0x10] sm:$0xff] }
  0x39   : > { %603 = vmatpush.bf16.msra.mxu0 %v804_v46  ;;  %v449_v2 = vadd.f32 %v846_v38, %v448_v57  ;;  %v458_v3 = vadd.f32 %v854_v42, %v457_v58  ;;  %v467_v8 = vadd.f32 %v862_v47, %v466_v61  ;;  %v476_v9 = vadd.f32 %v870_v51, %v475_v62 }
  0x3a   : > { %v414_v6 = vadd.f32 %v815_v11, %v413_v59  ;;  %v423_v7 = vadd.f32 %v823_v18, %v422_v60  ;;  %v432_v4 = vadd.f32 %v831_v25, %v431_v0  ;;  %v441_v5 = vadd.f32 %v839_v32, %v440_v1 }
  0x3b   : > { %v450_v12 = vadd.f32 %v847_v39, %v449_v2  ;;  %v459_v13 = vadd.f32 %v855_v43, %v458_v3  ;;  %v468_v10 = vadd.f32 %v863_v48, %v467_v8  ;;  %v477_v16 = vadd.f32 %v871_v52, %v476_v9 }
  0x3c   : > { %v415_v14 = vrot.slane %v414_v6, 4  ;;  %v424_v15 = vrot.slane %v423_v7, 4  ;;  %v433_v19 = vrot.slane %v432_v4, 4  ;;  %v442_v20 = vrot.slane %v441_v5, 4 }
  0x3d   : > { %604 = vmatpush.bf16.msra.mxu0 %v803_v63  ;;  %v451_v21 = vrot.slane %v450_v12, 4  ;;  %v460_v22 = vrot.slane %v459_v13, 4  ;;  %v469_v11 = vrot.slane %v468_v10, 4  ;;  %v478_v18 = vrot.slane %v477_v16, 4 }
  0x3e   : > { %v416_v23 = vadd.f32 %v415_v14, %v414_v6  ;;  %v425_v24 = vadd.f32 %v424_v15, %v423_v7  ;;  %v434_v26 = vadd.f32 %v433_v19, %v432_v4  ;;  %v443_v27 = vadd.f32 %v442_v20, %v441_v5 }
  0x3f   : > { %v452_v25 = vadd.f32 %v451_v21, %v450_v12  ;;  %v461_v28 = vadd.f32 %v460_v22, %v459_v13  ;;  %v470_v31 = vadd.f32 %v469_v11, %v468_v10  ;;  %v479_v32 = vadd.f32 %v478_v18, %v477_v16 }
  0x40   : > { %v417_v29 = vrot.slane %v416_v23, 2  ;;  %v426_v30 = vrot.slane %v425_v24, 2  ;;  %v435_v34 = vrot.slane %v434_v26, 2  ;;  %v444_v35 = vrot.slane %v443_v27, 2 }
  0x41   : > { %605 = vmatpush.bf16.msra.mxu0 %v802_v17  ;;  %v453_v36 = vrot.slane %v452_v25, 2  ;;  %v462_v37 = vrot.slane %v461_v28, 2  ;;  %v471_v40 = vrot.slane %v470_v31, 2  ;;  %v480_v41 = vrot.slane %v479_v32, 2 }
  0x42   : > { %v418_v38 = vadd.f32 %v417_v29, %v416_v23  ;;  %v427_v39 = vadd.f32 %v426_v30, %v425_v24  ;;  %v436_v42 = vadd.f32 %v435_v34, %v434_v26  ;;  %v445_v43 = vadd.f32 %v444_v35, %v443_v27 }
  0x43   : > { %v454_v44 = vadd.f32 %v453_v36, %v452_v25  ;;  %v463_v45 = vadd.f32 %v462_v37, %v461_v28  ;;  %v472_v48 = vadd.f32 %v471_v40, %v470_v31  ;;  %v481_v49 = vadd.f32 %v480_v41, %v479_v32  ;;  %v940_v36 = vld [vmem:[%s1242_s3] ss:$0 sm:$0xff] }
  0x44   : > { %v419_v46 = vrot.slane %v418_v38, 1  ;;  %v428_v47 = vrot.slane %v427_v39, 1  ;;  %v437_v51 = vrot.slane %v436_v42, 1  ;;  %v446_v52 = vrot.slane %v445_v43, 1  ;;  %v941_v40 = vld [vmem:[#allocation2] ss:$0 sm:$0xff] }
  0x45   : > { %606 = vmatpush.bf16.msra.mxu0 %v801_v33  ;;  %v455_v53 = vrot.slane %v454_v44, 1  ;;  %v464_v54 = vrot.slane %v463_v45, 1  ;;  %v473_v57 = vrot.slane %v472_v48, 1  ;;  %v482_v58 = vrot.slane %v481_v49, 1  ;;  %v939_v33 = vld [vmem:[%s1241_s2] ss:$0 sm:$0xff] }
  0x46   : > { %v420_v55 = vadd.f32 %v419_v46, %v418_v38  ;;  %v429_v56 = vadd.f32 %v428_v47, %v427_v39  ;;  %v438_v59 = vadd.f32 %v437_v51, %v436_v42  ;;  %v447_v60 = vadd.f32 %v446_v52, %v445_v43  ;;  %v628_v42 = vld [vmem:[%s339_s12] sm:$0xff] }
  0x47   : > { %v456_v61 = vadd.f32 %v455_v53, %v454_v44  ;;  %v465_v62 = vadd.f32 %v464_v54, %v463_v45  ;;  %v474_v63 = vadd.f32 %v473_v57, %v472_v48  ;;  %v483_v0 = vadd.f32 %v482_v58, %v481_v49 }
  0x48   : > { %v484_v1 = vmul.f32 0.03125, %v420_v55  ;;  %v485_v2 = vmul.f32 0.03125, %v429_v56  ;;  %v486_v3 = vmul.f32 0.03125, %v438_v59  ;;  %v487_v6 = vmul.f32 0.03125, %v447_v60 }
  0x49   : > { %607 = vmatpush.bf16.msra.mxu0 %v800_v50  ;;  %v488_v7 = vmul.f32 0.03125, %v456_v61  ;;  %v489_v8 = vmul.f32 0.03125, %v465_v62  ;;  %v490_v9 = vmul.f32 0.03125, %v474_v63  ;;  %v491_v4 = vmul.f32 0.03125, %v483_v0 }
  0x4a   : > { %v492_v5 = vpack.c.bf16 %v484_v1, %v484_v1  ;;  %v493_v12 = vpack.c.bf16 %v485_v2, %v485_v2  ;;  %v494_v13 = vpack.c.bf16 %v486_v3, %v486_v3  ;;  %v495_v14 = vpack.c.bf16 %v487_v6, %v487_v6 }
  0x4b   : > { %v496_v15 = vpack.c.bf16 %v488_v7, %v488_v7  ;;  %v497_v10 = vpack.c.bf16 %v489_v8, %v489_v8  ;;  %v498_v16 = vpack.c.bf16 %v490_v9, %v490_v9  ;;  %v499_v17 = vpack.c.bf16 %v491_v4, %v491_v4 }
  0x4c   : > { %v528_v19 = vunpack.c.l.b16 %v492_v5  ;;  %v529_v20 = vunpack.c.l.b16 %v493_v12  ;;  %v530_v21 = vunpack.c.l.b16 %v494_v13  ;;  %v531_v22 = vunpack.c.l.b16 %v495_v14 }
  0x4d   : > { %v532_v23 = vunpack.c.l.b16 %v496_v15  ;;  %v533_v24 = vunpack.c.l.b16 %v497_v10  ;;  %v534_v18 = vunpack.c.l.b16 %v498_v16  ;;  %v535_v27 = vunpack.c.l.b16 %v499_v17 }
  0x4e   : > { %v537_v11 = vsel %vm536_vm0, %v529_v20, %v528_v19  ;;  %vm546_vm5 = vcmask 1046534   ;;  %vm548_vm6 = vcmask 1047559   ;;  %vm626_vm7 = vcmask 7168  }
  0x4f   : > { %v539_v26 = vsel %vm538_vm1, %v530_v21, %v537_v11 }
  0x50   : > { %v541_v25 = vsel %vm540_vm2, %v531_v22, %v539_v26 }
  0x51   : > { %v543_v28 = vsel %vm542_vm3, %v532_v23, %v541_v25 }
  0x52   : > { %v545_v29 = vsel %vm544_vm4, %v533_v24, %v543_v28 }
  0x53   : > { %v547_v30 = vsel %vm546_vm5, %v534_v18, %v545_v29 }
  0x54   : > { %v549_v31 = vsel %vm548_vm6, %v535_v27, %v547_v30 }
  0x55   : > { %v550_v32 = vpack.c.b16 %v549_v31, %v549_v31 }
  0x57   : > { %608 = vmatmul.bf16.vlgmr.msra.gmra.mxu0 %v550_v32 }
  0xd4   : > { %v609_v34 = vpop.f32.mrf.mxu0 }
  0xd5   : > { %v610_v35 = vadd.f32 %v939_v33, %v609_v34 }
  0xd7   : > { %942 = vtanh.f32 %v610_v35 }
  0xdc   : > { %v611_v37 = vpop.f32.mrf.mxu0 }
  0xdd   : > { %v943_v38 = vpop.eup %942 }
  0xde   : > { %v618_v39 = vmul.f32 %v943_v38, %v940_v36 }
  0xe0   : > { %619 = vadd.xlane.f32.xlu0 %v618_v39 }
 0x153   : > { %v620_v41 = vpop.xlane.xlu0 %619 }
 0x154   : > { %v625_v43 = vadd.f32 %v941_v40, %v620_v41 }
 0x156   : > { %627 = vst.msk [vmem:[%s343_s29] sm:$0xff] %vm626_vm7, %v625_v43  ;;  %v629_v44 = vsub.f32 %v625_v43, %v628_v42 }
 0x158   : > { %v630_v45 = vmul.f32 %v629_v44, %v629_v44 }
 0x15a   : > { %631 = vst.msk [vmem:[%s347_s22] sm:$0xff] %vm626_vm7, %v630_v45 }
 0x15b PF: > { %p21_p4 = scmp.ge.s32.totalorder %s1133_s14, 4   ;;  %s1250_s26 = smov %s1034_s27 }
 0x15c   : > { %s1251_s27 = smov %s1038_s28  ;;  %s1252_s28 = smov %s1146_s19 }
 0x15d   : > { %s1253_s29 = smov %s1133_s14  ;;  %23 = sbr.rel (!%p21_p4) target bundleno = 7 (0x7), region = 103 }
 0x162   :  { %665 = vsyncpa [#allocation4], 1 }
 0x163   :  { %667 = vsyncpa [#allocation4 + $0x1], 1 }
 0x164   :  { %668 = vsyncpa [#allocation6], 1 }

</bundles_post_ra>
